<compile_context>
chip_gen: v7x
topology: tpu7x:2x2x1
jax: 0.10.0
libtpu: 0.0.40
codegen_flags: <defaults>
</compile_context>

<pallas_src>
import functools
import numpy as np

import jax
import jax.numpy as jnp
from jax import lax
from jax.experimental import pallas as pl
from jax.experimental.pallas import tpu as pltpu

BF16 = jnp.bfloat16
NEG_INF = -1e30          # plain Python float: matches the reference's finite mask fill and
                         # avoids NaNs for fully-masked rows (degenerates to a uniform softmax).


def _default_vmem_limit():
    try:
        cap = pltpu.get_tpu_info().vmem_capacity_bytes        # 64 MiB on v7x, 128 MiB on v5e/v6e
        return min((cap * 3) // 4, 112 * 1024 * 1024)
    except Exception:
        return 48 * 1024 * 1024                                # safe under v7x's 64 MiB physical VMEM


_VMEM_LIMIT = _default_vmem_limit()


# ------------------------------ tiling helpers ------------------------------

def _largest_divisor(dim, target):
    t = max(1, min(dim, target))
    while dim % t:
        t -= 1
    return t


def _tile_sublane(dim, target):
    """Block size for a second-to-last dim: full dim, or a multiple of 8 dividing it."""
    if dim <= target:
        return dim
    t = (target // 8) * 8
    while t >= 8:
        if dim % t == 0:
            return t
        t -= 8
    return dim   # TODO(synk): pad to the next (8,128) multiple instead of falling back to full dim.


def _tile_lane(dim, target):
    """Block size for a last (lane) dim: full dim, or a multiple of 128 dividing it."""
    if dim <= target:
        return dim
    t = (target // 128) * 128
    while t >= 128:
        if dim % t == 0:
            return t
        t -= 128
    return dim   # TODO(synk): pad to the next 128 multiple instead of falling back to full dim.


def _pick_head_block(n_bh, d_head, target):
    """Heads per attention block so the packed output block (tq, bt*d_head) is lane-legal:
    either bt*d_head is a multiple of 128, or one block covers all heads."""
    hi = min(n_bh, target)
    for bt in range(hi, 0, -1):
        if n_bh % bt == 0 and (bt * d_head) % 128 == 0:
            return bt
    for bt in range(hi + 1, n_bh):
        if n_bh % bt == 0 and (bt * d_head) % 128 == 0:
            return bt
    return n_bh


# ------------------------------ tiled linear (qkv_net) ------------------------------

def _matmul_kernel(x_ref, w_ref, o_ref, acc_ref):
    @pl.when(pl.program_id(2) == 0)
    def _():
        acc_ref[...] = jnp.zeros(acc_ref.shape, jnp.float32)

    acc_ref[...] += jnp.dot(x_ref[...], w_ref[...], preferred_element_type=jnp.float32)

    @pl.when(pl.program_id(2) == pl.num_programs(2) - 1)
    def _():
        o_ref[...] = acc_ref[...].astype(o_ref.dtype)


def pallas_linear(x, w, *, tm=256, tn=256, tk=512):
    """x: [M, K] @ w: [K, N] -> [M, N] bf16 (nn.Linear(bias=False), weight stored as [in, out])."""
    M, K = x.shape
    _, N = w.shape
    tm = _tile_sublane(M, tm)
    tn = _tile_lane(N, tn)
    tk = _tile_lane(K, tk)
    return pl.pallas_call(
        _matmul_kernel,
        out_shape=jax.ShapeDtypeStruct((M, N), BF16),
        grid_spec=pltpu.PrefetchScalarGridSpec(
            num_scalar_prefetch=0,
            grid=(M // tm, N // tn, K // tk),
            in_specs=[pl.BlockSpec((tm, tk), lambda i, j, k: (i, k)),
                      pl.BlockSpec((tk, tn), lambda i, j, k: (k, j))],
            out_specs=pl.BlockSpec((tm, tn), lambda i, j, k: (i, j)),
            scratch_shapes=[pltpu.VMEM((tm, tn), jnp.float32)]),
        compiler_params=pltpu.CompilerParams(
            dimension_semantics=("parallel", "parallel", "arbitrary"),
            vmem_limit_bytes=_VMEM_LIMIT),
    )(x.astype(BF16), w.astype(BF16))


# ------------------------------ motif conv (taps folded into one MXU contraction) ------------------------------

def _conv1d_kernel(x_ref, w_ref, b_ref, o_ref, *, taps, pad):
    # x_ref: [bt, L, C_in] bf16     w_ref: [K*C_in, C_out] bf16   (row order: tap-major, C_in minor)
    # b_ref: [1, C_out] f32         o_ref: [bt, L, C_out] bf16
    bt, out_len, c_in = x_ref.shape
    x = x_ref[...]
    if pad > 0:   # 'same' padding done in VMEM -> no padded HBM copy in the wrapper
        zeros = jnp.zeros((bt, pad, c_in), x.dtype)
        xp = jnp.concatenate([zeros, x, zeros], axis=1)
    else:
        xp = x
    # Concatenate the K shifted windows along channels -> single tall matmul on the MXU.
    win = jnp.concatenate([xp[:, t:t + out_len, :] for t in range(taps)], axis=-1)
    acc = jnp.dot(win.reshape(bt * out_len, taps * c_in), w_ref[...],
                  preferred_element_type=jnp.float32)
    acc = acc + b_ref[...]
    o_ref[...] = acc.reshape(o_ref.shape).astype(o_ref.dtype)


def pallas_conv1d_same(x, weight, bias, *, bt=32):
    """'same' Conv1d over the sequence axis in channel-last layout.
    x: [B, L, C_in], weight: [C_out, C_in, K] (PyTorch Conv1d layout), bias: [C_out]."""
    B, L, C_in = x.shape
    C_out, _, K = weight.shape
    pad = K // 2   # TODO(synk): matches nn.Conv1d(..., padding=conv_size // 2) for odd conv_size only.
    # [C_out, C_in, K] -> [K*C_in, C_out] with tap-major row order (matches the window concat).
    w_mat = jnp.transpose(weight, (2, 1, 0)).reshape(K * C_in, C_out).astype(BF16)
    b2 = bias.reshape(1, C_out).astype(jnp.float32)
    bt = _largest_divisor(B, bt)
    # TODO(synk): for very long sequences / pre_conv at large d_model, also tile over L with a
    #   (K-1) halo to bound the per-step VMEM working set (v7x 64 MiB).
    return pl.pallas_call(
        functools.partial(_conv1d_kernel, taps=K, pad=pad),
        out_shape=jax.ShapeDtypeStruct((B, L, C_out), BF16),
        grid_spec=pltpu.PrefetchScalarGridSpec(
            num_scalar_prefetch=0,
            grid=(B // bt,),
            in_specs=[pl.BlockSpec((bt, L, C_in), lambda b: (b, 0, 0)),
                      pl.BlockSpec((K * C_in, C_out), lambda b: (0, 0)),
                      pl.BlockSpec((1, C_out), lambda b: (0, 0))],
            out_specs=pl.BlockSpec((bt, L, C_out), lambda b: (b, 0, 0))),
        compiler_params=pltpu.CompilerParams(
            dimension_semantics=("parallel",),
            vmem_limit_bytes=_VMEM_LIMIT),
    )(x.astype(BF16), w_mat, b2)


# ------------------------------ flash attention (online softmax, packed-head output) ------------------------------

def _flash_attn_kernel(*refs, scale, causal, has_mask, block_q, block_k, block_b, d_head):
    if has_mask:
        mask_ref, q_ref, k_ref, v_ref, o_ref, m_ref, l_ref, acc_ref = refs
    else:
        q_ref, k_ref, v_ref, o_ref, m_ref, l_ref, acc_ref = refs
    qi = pl.program_id(1)
    kv = pl.program_id(2)

    @pl.when(kv == 0)
    def _():
        m_ref[...] = jnp.full(m_ref.shape, -jnp.inf, jnp.float32)
        l_ref[...] = jnp.zeros(l_ref.shape, jnp.float32)
        acc_ref[...] = jnp.zeros(acc_ref.shape, jnp.float32)

    def _update():
        # Softmax scale folded into q: touches bt*tq*D elements instead of bt*tq*tk scores.
        q = (q_ref[...].astype(jnp.float32) * scale).astype(BF16)
        s = jnp.einsum('bqd,bkd->bqk', q, k_ref[...],
                       preferred_element_type=jnp.float32)
        if causal:
            row = lax.broadcasted_iota(jnp.int32, (block_q, block_k), 0) + qi * block_q
            col = lax.broadcasted_iota(jnp.int32, (block_q, block_k), 1) + kv * block_k
            s = jnp.where((col > row)[None, :, :], NEG_INF, s)
        if has_mask:
            s = jnp.where((mask_ref[...] > 0)[None, :, :], NEG_INF, s)

        m_prev = m_ref[...]
        m_new = jnp.maximum(m_prev, s.max(axis=-1, keepdims=True))
        alpha = jnp.exp(m_prev - m_new)
        p = jnp.exp(s - m_new)
        l_ref[...] = alpha * l_ref[...] + p.sum(axis=-1, keepdims=True)
        acc_ref[...] = alpha * acc_ref[...] + jnp.einsum(
            'bqk,bkd->bqd', p.astype(BF16), v_ref[...],
            preferred_element_type=jnp.float32)
        m_ref[...] = m_new

    if causal:
        # Skip kv blocks entirely in the future of this q block (~halves MXU work for causal).
        @pl.when(kv * block_k <= qi * block_q + (block_q - 1))
        def _():
            _update()
    else:
        _update()

    @pl.when(kv == pl.num_programs(2) - 1)
    def _():
        out = acc_ref[...] / l_ref[...]                        # [bt, tq, D], exact reciprocal
        # Pack heads along lanes -> lane-dense output block, no XLA transpose afterwards.
        o_ref[...] = jnp.concatenate([out[h] for h in range(block_b)],
                                     axis=-1).astype(o_ref.dtype)


def pallas_flash_attention(q, k, v, *, scale, causal=False, attn_mask=None,
                           block_b=8, block_q=256, block_k=512):
    """q/k/v: [BH, L, D] (BH = bsz*n_head, head-minor).  Optional attn_mask [Lq, Lk]
    (>0 = masked, Transformer-XL convention).  Returns a lane-dense bf16 slab [Lq, BH*D],
    which is a pure reshape away from the [qlen*bsz, n_head*d_head] o_net input."""
    BH, Lq, D = q.shape
    Lk = k.shape[1]
    has_mask = attn_mask is not None
    bt = _pick_head_block(BH, D, block_b)
    tq = _tile_sublane(Lq, block_q)
    tk = _tile_lane(Lk, block_k) if has_mask else _tile_sublane(Lk, block_k)

    kernel = functools.partial(_flash_attn_kernel, scale=scale, causal=causal,
                               has_mask=has_mask, block_q=tq, block_k=tk,
                               block_b=bt, d_head=D)

    in_specs, args = [], []
    if has_mask:
        # bf16 mask stream (2x less DMA than f32).  TODO(synk): generate from scalar-prefetched
        #   per-row lengths to drop the stream entirely; it is re-fetched per head-batch block.
        in_specs.append(pl.BlockSpec((tq, tk), lambda b, qi, ki: (qi, ki)))
        args.append(attn_mask.astype(BF16))
    in_specs += [pl.BlockSpec((bt, tq, D), lambda b, qi, ki: (b, qi, 0)),
                 pl.BlockSpec((bt, tk, D), lambda b, qi, ki: (b, ki, 0)),
                 pl.BlockSpec((bt, tk, D), lambda b, qi, ki: (b, ki, 0))]
    args += [q.astype(BF16), k.astype(BF16), v.astype(BF16)]

    return pl.pallas_call(
        kernel,
        out_shape=jax.ShapeDtypeStruct((Lq, BH * D), BF16),
        grid_spec=pltpu.PrefetchScalarGridSpec(
            num_scalar_prefetch=0,
            grid=(BH // bt, Lq // tq, Lk // tk),
            in_specs=in_specs,
            out_specs=pl.BlockSpec((tq, bt * D), lambda b, qi, ki: (qi, b)),
            scratch_shapes=[pltpu.VMEM((bt, tq, 1), jnp.float32),
                            pltpu.VMEM((bt, tq, 1), jnp.float32),
                            pltpu.VMEM((bt, tq, D), jnp.float32)]),
        compiler_params=pltpu.CompilerParams(
            dimension_semantics=("parallel", "parallel", "arbitrary"),
            vmem_limit_bytes=_VMEM_LIMIT),
    )(*args)


# ------------------------------ fused o_net + residual + LayerNorm ------------------------------

def _onet_ln_kernel(a_ref, w_ref, res_ref, g_ref, b_ref, o_ref, acc_ref, *, eps):
    kk = pl.program_id(1)

    @pl.when(kk == 0)
    def _():
        acc_ref[...] = jnp.zeros(acc_ref.shape, jnp.float32)

    acc_ref[...] += jnp.dot(a_ref[...], w_ref[...], preferred_element_type=jnp.float32)

    @pl.when(kk == pl.num_programs(1) - 1)
    def _():
        z = acc_ref[...] + res_ref[...]
        mu = jnp.mean(z, axis=-1, keepdims=True)
        var = jnp.mean(jnp.square(z - mu), axis=-1, keepdims=True)
        zn = (z - mu) * lax.rsqrt(var + eps)
        o_ref[...] = (zn * g_ref[...] + b_ref[...]).astype(o_ref.dtype)


def pallas_onet_residual_layernorm(a, w, residual, gamma, beta, *, eps=1e-5, tm=256, tk=256):
    """LayerNorm(residual + a @ w).  a: [M, K] bf16, w: [K, N] bf16, residual: [M, N] f32."""
    M, K = a.shape
    _, N = w.shape
    tm = _tile_sublane(M, tm)
    tk = _tile_lane(K, tk)
    return pl.pallas_call(
        functools.partial(_onet_ln_kernel, eps=eps),
        out_shape=jax.ShapeDtypeStruct((M, N), jnp.float32),
        grid_spec=pltpu.PrefetchScalarGridSpec(
            num_scalar_prefetch=0,
            grid=(M // tm, K // tk),
            in_specs=[pl.BlockSpec((tm, tk), lambda i, k: (i, k)),
                      pl.BlockSpec((tk, N), lambda i, k: (k, 0)),
                      pl.BlockSpec((tm, N), lambda i, k: (i, 0)),
                      pl.BlockSpec((1, N), lambda i, k: (0, 0)),
                      pl.BlockSpec((1, N), lambda i, k: (0, 0))],
            out_specs=pl.BlockSpec((tm, N), lambda i, k: (i, 0)),
            scratch_shapes=[pltpu.VMEM((tm, N), jnp.float32)]),
        compiler_params=pltpu.CompilerParams(
            dimension_semantics=("parallel", "arbitrary"),
            vmem_limit_bytes=_VMEM_LIMIT),
    )(a.astype(BF16), w.astype(BF16), residual, gamma.reshape(1, N), beta.reshape(1, N))


# ------------------------------ glue / module ------------------------------

def rel_shift(x):
    """Plain-JAX equivalent of RelMultiHeadAttn._rel_shift (zero_triu=False).
    x: [qlen, klen, bsz, n_head]."""
    q, k = x.shape[0], x.shape[1]
    zero_pad = jnp.zeros((q, 1) + x.shape[2:], x.dtype)
    x_padded = jnp.concatenate([zero_pad, x], axis=1)
    x_padded = x_padded.reshape((k + 1, q) + x.shape[2:])
    return x_padded[1:].reshape(x.shape)


def init_params(key, n_head, d_model, d_head, conv_size, pre_conv=False):
    ks = jax.random.split(key, 12)
    p = {}
    # Linear / conv weights stored pre-cast to bf16 (MXU operands); biases & LN params stay f32.
    p["qkv_w"] = (0.02 * jax.random.normal(ks[0], (d_model, 3 * n_head * d_head), jnp.float32)).astype(BF16)
    p["o_w"] = (0.02 * jax.random.normal(ks[1], (n_head * d_head, d_model), jnp.float32)).astype(BF16)
    p["ln_g"] = jnp.ones((d_model,), jnp.float32)
    p["ln_b"] = jnp.zeros((d_model,), jnp.float32)
    if conv_size != 0:
        if pre_conv:
            p["pre_conv_w"] = (0.02 * jax.random.normal(ks[2], (d_model, d_model, conv_size), jnp.float32)).astype(BF16)
            p["pre_conv_b"] = 0.02 * jax.random.normal(ks[3], (d_model,), jnp.float32)
        else:
            p["conv_q_w"] = (0.05 * jax.random.normal(ks[4], (d_head, d_head, conv_size), jnp.float32)).astype(BF16)
            p["conv_q_b"] = 0.05 * jax.random.normal(ks[5], (d_head,), jnp.float32)
            p["conv_k_w"] = (0.05 * jax.random.normal(ks[6], (d_head, d_head, conv_size), jnp.float32)).astype(BF16)
            p["conv_k_b"] = 0.05 * jax.random.normal(ks[7], (d_head,), jnp.float32)
            p["conv_v_w"] = (0.05 * jax.random.normal(ks[8], (d_head, d_head, conv_size), jnp.float32)).astype(BF16)
            p["conv_v_b"] = 0.05 * jax.random.normal(ks[9], (d_head,), jnp.float32)
    return p


def rel_multihead_attn_forward(params, w, r=None, attn_mask=None, mems=None, *,
                               n_head, d_head, conv_size, pre_conv=False, causal=False):
    # TODO(synk): RelMultiHeadAttn.forward is abstract in the reference module; the relative
    #   positional term (r / r_w_bias / r_r_bias via a subclass r_net + _rel_shift) is not
    #   defined by the base class, so `r` is accepted but unused here.
    # TODO(synk): `mems` concatenation and dropout/dropatt (identity in eval mode) are not applied.
    del r, mems
    qlen, bsz, d_model = w.shape
    scale = 1.0 / (d_head ** 0.5)

    w2d = w.reshape(qlen * bsz, d_model)                 # f32 residual for the LN kernel
    x2d = w2d.astype(BF16)

    if conv_size != 0 and pre_conv:
        wc = jnp.transpose(w, (1, 0, 2)).astype(BF16)    # [bsz, qlen, d_model]
        wc = pallas_conv1d_same(wc, params["pre_conv_w"], params["pre_conv_b"])
        x2d = jnp.transpose(wc, (1, 0, 2)).reshape(qlen * bsz, d_model)

    heads = pallas_linear(x2d, params["qkv_w"]).reshape(qlen, bsz, 3, n_head, d_head)  # bf16

    def to_bhld(t):  # [qlen, bsz, n_head, d_head] -> [bsz*n_head, qlen, d_head] (bf16 transpose)
        return jnp.transpose(t, (1, 2, 0, 3)).reshape(bsz * n_head, qlen, d_head)

    q = to_bhld(heads[:, :, 0])
    k = to_bhld(heads[:, :, 1])
    v = to_bhld(heads[:, :, 2])

    if conv_size != 0 and not pre_conv:
        # motif convs run in [BH, L, D] (the attention layout) — no NCL round-trip.
        q = pallas_conv1d_same(q, params["conv_q_w"], params["conv_q_b"])
        k = pallas_conv1d_same(k, params["conv_k_w"], params["conv_k_b"])
        v = pallas_conv1d_same(v, params["conv_v_w"], params["conv_v_b"])

    # TODO(synk): only 2-D [qlen, klen] attention masks are supported here (no per-sample mask).
    attn_slab = pallas_flash_attention(q, k, v, scale=scale, causal=causal,
                                       attn_mask=attn_mask)             # [qlen, bsz*n_head*d_head]
    # Lane-dense slab is already (qlen, bsz, n_head*d_head) in row-major order -> pure reshape.
    attn_vec = attn_slab.reshape(qlen * bsz, n_head * d_head)

    out = pallas_onet_residual_layernorm(attn_vec, params["o_w"], w2d,
                                         params["ln_g"], params["ln_b"])
    return out.reshape(qlen, bsz, d_model)


# ------------------------------ pure-JAX reference (bf16-matmul mirrored) ------------------------------

def reference_forward(params, w, attn_mask, *, n_head, d_head, conv_size, pre_conv=False):
    qlen, bsz, d_model = w.shape
    scale = 1.0 / (d_head ** 0.5)

    def mm(a, b):
        return jnp.dot(a.astype(BF16), b.astype(BF16), preferred_element_type=jnp.float32)

    def conv_ref(x, wt, b):      # x [B, L, C_in], wt [C_out, C_in, K], b [C_out]
        K = wt.shape[2]
        pad = K // 2
        L = x.shape[1]
        xp = jnp.pad(x.astype(jnp.float32), ((0, 0), (pad, pad), (0, 0)))
        out = jnp.zeros((x.shape[0], L, wt.shape[0]), jnp.float32)
        for k in range(K):
            out = out + jnp.einsum('blc,oc->blo', xp[:, k:k + L, :].astype(BF16),
                                   wt[:, :, k].astype(BF16),
                                   preferred_element_type=jnp.float32)
        return out + b[None, None, :]

    w2d = w.reshape(qlen * bsz, d_model)
    x2d = w2d
    if conv_size != 0 and pre_conv:
        wc = jnp.transpose(w, (1, 0, 2))
        wc = conv_ref(wc, params["pre_conv_w"], params["pre_conv_b"])
        x2d = jnp.transpose(wc, (1, 0, 2)).reshape(qlen * bsz, d_model)

    heads = mm(x2d, params["qkv_w"]).reshape(qlen, bsz, 3, n_head, d_head)

    def to_bhld(t):
        return jnp.transpose(t, (1, 2, 0, 3)).reshape(bsz * n_head, qlen, d_head)

    q, k, v = to_bhld(heads[:, :, 0]), to_bhld(heads[:, :, 1]), to_bhld(heads[:, :, 2])

    if conv_size != 0 and not pre_conv:
        q = conv_ref(q, params["conv_q_w"], params["conv_q_b"])
        k = conv_ref(k, params["conv_k_w"], params["conv_k_b"])
        v = conv_ref(v, params["conv_v_w"], params["conv_v_b"])

    s = jnp.einsum('bqd,bkd->bqk', q.astype(BF16), k.astype(BF16),
                   preferred_element_type=jnp.float32) * scale
    if attn_mask is not None:
        s = jnp.where(attn_mask[None].astype(bool), -1e30, s)
    p = jax.nn.softmax(s, axis=-1)
    av = jnp.einsum('bqk,bkd->bqd', p.astype(BF16), v.astype(BF16),
                    preferred_element_type=jnp.float32)
    av = av.reshape(bsz, n_head, qlen, d_head)
    av = jnp.transpose(av, (2, 0, 1, 3)).reshape(qlen * bsz, n_head * d_head)
    ao = mm(av, params["o_w"])

    z = w2d + ao
    mu = z.mean(-1, keepdims=True)
    var = ((z - mu) ** 2).mean(-1, keepdims=True)
    out = (z - mu) / jnp.sqrt(var + 1e-5) * params["ln_g"] + params["ln_b"]
    return out.reshape(qlen, bsz, d_model)


# ------------------------------ main ------------------------------

if __name__ == "__main__":
    n_head, d_model, d_head, conv_size = 2, 32, 8, 7
    qlen, bsz = 8, 2

    key = jax.random.PRNGKey(0)
    kp, kw, kr = jax.random.split(key, 3)
    params = init_params(kp, n_head, d_model, d_head, conv_size, pre_conv=False)

    w = jax.random.normal(kw, (qlen, bsz, d_model), jnp.float32)
    r = jax.random.normal(kr, (qlen, 1, d_model), jnp.float32)          # accepted, unused (abstract base fwd)
    attn_mask = jnp.triu(jnp.ones((qlen, qlen), jnp.float32), k=1)      # 1 = masked (causal, TXL byte-mask style)

    fwd = functools.partial(rel_multihead_attn_forward,
                            n_head=n_head, d_head=d_head,
                            conv_size=conv_size, pre_conv=False)

    # Fast path: causal mask generated in-kernel + future kv blocks skipped (no mask stream).
    out_causal = jax.block_until_ready(fwd(params, w, r, None, causal=True))
    # General path: explicit [qlen, klen] attention mask streamed (bf16) per kv tile.
    out_masked = jax.block_until_ready(fwd(params, w, r, attn_mask))

    ref = reference_forward(params, w, attn_mask,
                            n_head=n_head, d_head=d_head,
                            conv_size=conv_size, pre_conv=False)
    ref = np.asarray(ref)

    np.testing.assert_allclose(np.asarray(out_causal, dtype=np.float32), ref, rtol=1e-2, atol=1e-2)
    np.testing.assert_allclose(np.asarray(out_masked, dtype=np.float32), ref, rtol=1e-2, atol=1e-2)

    print("KERNEL_OK")
</pallas_src>

<mosaic_0001>
module attributes {stable_mosaic.version = 11 : i64} {
  func.func @_matmul_kernel(%arg0: i32, %arg1: i32, %arg2: i32, %arg3: memref<16x32xbf16, #tpu.memory_space<vmem>>, %arg4: memref<32x48xbf16, #tpu.memory_space<vmem>>, %arg5: memref<16x48xbf16, #tpu.memory_space<vmem>>, %arg6: memref<16x48xf32, #tpu.memory_space<vmem>>) attributes {dimension_semantics = [#tpu.dimension_semantics<parallel>, #tpu.dimension_semantics<parallel>, #tpu.dimension_semantics<arbitrary>], iteration_bounds = array<i64: 1, 1, 1>, scalar_prefetch = 0 : i64, scratch_operands = 1 : i64, tpu.core_type = #tpu.core_type<tc>, window_params = [{transform_indices = @transform_0, window_bounds = array<i64: 16, 32>}, {transform_indices = @transform_1, window_bounds = array<i64: 32, 48>}, {transform_indices = @transform_2, window_bounds = array<i64: 16, 48>}]} {
    %c0_i32 = arith.constant 0 : i32
    %0 = arith.cmpi eq, %arg2, %c0_i32 : i32
    %1 = arith.extui %0 : i1 to i32
    %c0_i32_0 = arith.constant 0 : i32
    %2 = arith.cmpi ne, %1, %c0_i32_0 : i32
    scf.if %2 {
      %cst_10 = arith.constant 0.000000e+00 : f32
      %12 = vector.broadcast %cst_10 : f32 to vector<16x48xf32>
      %c0_11 = arith.constant 0 : index
      %c0_12 = arith.constant 0 : index
      %13 = vector.load %arg6[%c0_11, %c0_12] : memref<16x48xf32, #tpu.memory_space<vmem>>, vector<16x48xf32>
      tpu.vector_store %arg6[%c0_11, %c0_12], %12 {strides = array<i32>} : memref<16x48xf32, #tpu.memory_space<vmem>>, vector<16x48xf32>,
    } else {
    }
    %c0 = arith.constant 0 : index
    %c0_1 = arith.constant 0 : index
    %3 = vector.load %arg6[%c0, %c0_1] : memref<16x48xf32, #tpu.memory_space<vmem>>, vector<16x48xf32>
    %c0_2 = arith.constant 0 : index
    %c0_3 = arith.constant 0 : index
    %4 = vector.load %arg3[%c0_2, %c0_3] : memref<16x32xbf16, #tpu.memory_space<vmem>>, vector<16x32xbf16>
    %c0_4 = arith.constant 0 : index
    %c0_5 = arith.constant 0 : index
    %5 = vector.load %arg4[%c0_4, %c0_5] : memref<32x48xbf16, #tpu.memory_space<vmem>>, vector<32x48xbf16>
    %cst = arith.constant dense<0.000000e+00> : vector<16x48xf32>
    %6 = tpu.matmul %4, %5, %cst {dimension_numbers = #tpu.dot_dimension_numbers<[1], [0], [0], [1], [0, 0, 1, 1], [], []>} : vector<16x32xbf16>, vector<32x48xbf16>, vector<16x48xf32> -> vector<16x48xf32>
    %7 = arith.addf %3, %6 : vector<16x48xf32>
    %c0_6 = arith.constant 0 : index
    %c0_7 = arith.constant 0 : index
    %8 = vector.load %arg6[%c0_6, %c0_7] : memref<16x48xf32, #tpu.memory_space<vmem>>, vector<16x48xf32>
    tpu.vector_store %arg6[%c0_6, %c0_7], %7 {strides = array<i32>} : memref<16x48xf32, #tpu.memory_space<vmem>>, vector<16x48xf32>,
    %c0_i32_8 = arith.constant 0 : i32
    %9 = arith.cmpi eq, %arg2, %c0_i32_8 : i32
    %10 = arith.extui %9 : i1 to i32
    %c0_i32_9 = arith.constant 0 : i32
    %11 = arith.cmpi ne, %10, %c0_i32_9 : i32
    scf.if %11 {
      %c0_10 = arith.constant 0 : index
      %c0_11 = arith.constant 0 : index
      %12 = vector.load %arg6[%c0_10, %c0_11] : memref<16x48xf32, #tpu.memory_space<vmem>>, vector<16x48xf32>
      %13 = arith.truncf %12 : vector<16x48xf32> to vector<16x48xbf16>
      %c0_12 = arith.constant 0 : index
      %c0_13 = arith.constant 0 : index
      %14 = vector.load %arg5[%c0_12, %c0_13] : memref<16x48xbf16, #tpu.memory_space<vmem>>, vector<16x48xbf16>
      tpu.vector_store %arg5[%c0_12, %c0_13], %13 {strides = array<i32>} : memref<16x48xbf16, #tpu.memory_space<vmem>>, vector<16x48xbf16>,
    } else {
    }
    return
  }
  func.func @transform_0(%arg0: i32, %arg1: i32, %arg2: i32) -> (i32, i32) {
    %c0_i32 = arith.constant 0 : i32
    return %arg0, %arg2 : i32, i32
  }
  func.func @transform_1(%arg0: i32, %arg1: i32, %arg2: i32) -> (i32, i32) {
    %c0_i32 = arith.constant 0 : i32
    return %arg2, %arg1 : i32, i32
  }
  func.func @transform_2(%arg0: i32, %arg1: i32, %arg2: i32) -> (i32, i32) {
    %c0_i32 = arith.constant 0 : i32
    return %arg0, %arg1 : i32, i32
  }
}

</mosaic_0001>

<bundles_post_ra>
// kernel: tpu_custom_call.1
= control target key start
LH: loop header
LB: loop body
LE: loop exit
PB: predicated region body
PF: predicated region fallthrough
CT: control target
= control target key end

     0   :  { %7 = vsyncpa [#allocation4], 0  ;;  %s329_s0 = inlined_call_operand.hbm [shape: bf16[16,32], index: 0, kind: input, shape index: {}]   ;;  %s330_s1 = inlined_call_operand.hbm [shape: bf16[32,48], index: 1, kind: input, shape index: {}]   ;;  %s331_s2 = inlined_call_operand.hbm [shape: bf16[16,48], index: 2, kind: output, shape index: {}]  }
   0x1   :  { %8 = vsyncpa [#allocation7], 0 }
   0x2   :  { %9 = vsyncpa [#allocation5], 0  ;;  %s258_s9 = smov [#allocation3]   ;;  %s186_s13 = scalar_lea.hbm %s329_s0, 128 }
   0x3   :  { %s15_s10 = sshll.u32 %s258_s9, 4  ;;  %p187_p0 = scmp.ne.s32.totalorder %s329_s0, %s186_s13  ;;  %s16_s10 = int_to_ptr.vmem [resolvable:$true] %s15_s10 }
   0x4   :  { %p190_p1 = scmp.lt.u32.totalorder %s186_s13, %s329_s0 }
   0x6   :  { %p192_p2 = pnand %p190_p1, %p187_p0 }
   0x8   :  { %195 = shalt.err (!%p192_p2)
}
   0x9   :  { %s196_s18 = scalar_lea.vmem %s16_s10, 128  ;;  %p201_p4 = scmp.lt.s32.totalorder %s16_s10, %s16_s10 }
   0xa   :  { %p197_p3 = scmp.ne.s32.totalorder %s16_s10, %s196_s18  ;;  %p202_p5 = scmp.lt.s32.totalorder %s196_s18, %s196_s18 }
   0xc   :  { %p203_p6 = por %p202_p5, %p201_p4 }
   0xe   :  { %p204_p7 = pnand %p203_p6, %p197_p3 }
  0x10   :  { %207 = shalt.err (!%p204_p7)
}
  0x11   :  { %s259_s19 = smov 64   ;;  %s260_s20 = smov 4  }
  0x12   :  { %21 = dma.hbm_to_vmem [thread:$0]  %s329_s0, 128, %s16_s10, [#allocation4], %s259_s19, %s259_s19, %s260_s20  }
  0x13   :  { %s261_s23 = smov [#allocation6]   ;;  %s208_s27 = scalar_lea.hbm %s330_s1, 256 }
  0x14   :  { %s27_s24 = sshll.u32 %s261_s23, 4  ;;  %p209_p8 = scmp.ne.s32.totalorder %s330_s1, %s208_s27  ;;  %s28_s24 = int_to_ptr.vmem [resolvable:$true] %s27_s24 }
  0x15   :  { %p212_p9 = scmp.lt.u32.totalorder %s208_s27, %s330_s1 }
  0x17   :  { %p214_p10 = pnand %p212_p9, %p209_p8 }
  0x19   :  { %217 = shalt.err (!%p214_p10)
}
  0x1a   :  { %s218_s4 = scalar_lea.vmem %s28_s24, 256  ;;  %p223_p12 = scmp.lt.s32.totalorder %s28_s24, %s28_s24 }
  0x1b   :  { %p219_p11 = scmp.ne.s32.totalorder %s28_s24, %s218_s4  ;;  %p224_p13 = scmp.lt.s32.totalorder %s218_s4, %s218_s4 }
  0x1d   :  { %p225_p0 = por %p224_p13, %p223_p12 }
  0x1f   :  { %p226_p1 = pnand %p225_p0, %p219_p11 }
  0x21   :  { %229 = shalt.err (!%p226_p1)
}
  0x22   :  { %33 = dma.hbm_to_vmem [thread:$0]  %s330_s1, 256, %s28_s24, [#allocation7], %s259_s19, %s259_s19, %s260_s20  }
  0x23   :  { %252 = dma.done.wait [#allocation4], 128  }
  0x24   :  { %253 = vsyncadd [#allocation4], 4294967168 }
  0x25   :  { %254 = dma.done.wait [#allocation7], 256  }
  0x26   :  { %255 = vsyncadd [#allocation7], 4294967040  ;;  %vm45_vm0 = vcmask 392192   ;;  %v262_v0 = vmov 0.0   ;;  %vm263_vm1 = vmmov 0   ;;  %v183_v1 = vld [vmem:[#allocation6] sm:$0xff]  }
  0x27   :  { %46 = vst.msk [vmem:[#allocation2] sm:$0xff] %vm45_vm0, %v262_v0  ;;  %47 = vst.msk [vmem:[#allocation2 + $0x8] sm:$0xff] %vm45_vm0, %v262_v0  ;;  %168 = vmatprep.subr.bf16.mxu0 %v262_v0  ;;  %172 = vmatprep.mubr.msk.bf16.mxu0 %vm263_vm1, %v262_v0  ;;  %v184_v2 = vld [vmem:[#allocation6 + $0x8] sm:$0xff]   ;;  %v185_v3 = vld [vmem:[#allocation3] sm:$0xff]   ;;  %vm73_vm2 = vcmask 261120   ;;  %vm136_vm3 = vcmask 388096  }
  0x28   :  { %169 = vmatpush3.bf16.msra.mxu0 %v183_v1  ;;  %s264_s1 = smov [#allocation8]  }
  0x29   :  { %170 = vmatprep.subr.bf16.mxu0 %v262_v0  ;;  %s144_s6 = sshll.u32 %s264_s1, 4  ;;  %s145_s6 = int_to_ptr.vmem [resolvable:$true] %s144_s6 }
  0x2a   :  { %s230_s7 = scalar_lea.vmem %s145_s6, 128  ;;  %p235_p3 = scmp.lt.s32.totalorder %s145_s6, %s145_s6 }
  0x2b   :  { %p231_p2 = scmp.ne.s32.totalorder %s145_s6, %s230_s7  ;;  %p236_p4 = scmp.lt.s32.totalorder %s230_s7, %s230_s7 }
  0x2c   :  { %171 = vmatpush3.bf16.msra.mxu0 %v184_v2 }
  0x2d   :  { %p237_p5 = por %p236_p4, %p235_p3 }
  0x2e   :  { %v48_v4 = vld [vmem:[#allocation2] sm:$0xff]  ;;  %v49_v6 = vld [vmem:[#allocation2 + $0x8] sm:$0xff] }
  0x2f   :  { %173 = vmatmul.mubr.msk.bf16.vlgmr.msra.gmra.mrb[0].mxu0 %vm73_vm2, %v185_v3  ;;  %p238_p6 = pnand %p237_p5, %p231_p2 }
 0x102   :  { %v111_v5 = vpop.f32.mrb[0].mxu0 }
 0x103   :  { %v118_v7 = vadd.f32 %v111_v5, %v48_v4  ;;  %v174_v8 = vpop.f32.mrb[1].mxu0 }
 0x104   :  { %v114_v9 = vpop.f32.mrb[2].mxu0 }
 0x105   :  { %121 = vst.msk [vmem:[#allocation2] sm:$0xff] %vm45_vm0, %v118_v7  ;;  %v119_v10 = vadd.f32 %v114_v9, %v49_v6  ;;  %v175_v11 = vpop.f32.mrb[3].mxu0 }
 0x107   :  { %122 = vst.msk [vmem:[#allocation2 + $0x8] sm:$0xff] %vm45_vm0, %v119_v10 }
 0x10c   :  { %v126_v12 = vld [vmem:[#allocation2] sm:$0xff] }
 0x10d   :  { %v163_v13 = vpack.c.bf16 %v126_v12, %v126_v12 }
 0x10e   :  { %v127_v14 = vld [vmem:[#allocation2 + $0x8] sm:$0xff] }
 0x10f   :  { %v164_v15 = vpack.c.bf16 %v127_v14, %v127_v14  ;;  %137 = vst.msk [vmem:[#allocation8] sm:$0xf] %vm136_vm3, %v163_v13 }
 0x111   :  { %138 = vst.msk [vmem:[#allocation8 + $0x4] sm:$0xf] %vm136_vm3, %v164_v15 }
 0x112   :  { %241 = shalt.err (!%p238_p6)
}
 0x113   :  { %s242_s10 = scalar_lea.hbm %s331_s2, 128 }
 0x114   :  { %p243_p7 = scmp.ne.s32.totalorder %s331_s2, %s242_s10  ;;  %p246_p8 = scmp.lt.u32.totalorder %s242_s10, %s331_s2 }
 0x116   :  { %p248_p9 = pnand %p246_p8, %p243_p7 }
 0x118   :  { %251 = shalt.err (!%p248_p9)
}
 0x119   :  { %150 = dma.vmem_to_hbm [thread:$0]  %s145_s6, 128, %s331_s2, [#allocation5], %s259_s19, %s259_s19, %s260_s20  }
 0x11a   :  { %256 = dma.done.wait [#allocation5], 128  }
 0x11b   :  { %257 = vsyncadd [#allocation5], 4294967168 }
 0x11c   :  { %154 = vsyncpa [#allocation4], 1 }
 0x11d   :  { %155 = vsyncpa [#allocation7], 1 }
 0x11e   :  { %156 = vsyncpa [#allocation5], 1 }

</bundles_post_ra>
